<compile_context>
chip_gen: v7x
topology: tpu7x:2x2x1
jax: 0.10.0
libtpu: 0.0.40
codegen_flags: <defaults>
</compile_context>

<pallas_src>
import numpy as np

import jax
import jax.numpy as jnp
from jax.experimental import pallas as pl
from jax.experimental.pallas import tpu as pltpu


def _score_interface_kernel(x_ref, o_ref):
    # TODO(synk): base-class forward() raises NotImplementedError — there is no
    # score-network math to translate.  A concrete subclass's score computation
    # REPLACES this identity pass-through (do not keep both: on v5e the extra
    # full-tile vst would contend for the single vector-store slot).
    o_ref[...] = x_ref[...]


# ~8 MiB per tile.  With double-buffered in + out blocks the VMEM working set
# is ~4x the tile (~32 MiB).  We raise the scoped-VMEM limit explicitly so the
# same numbers hold on every generation (v5e/v6e: 128 MiB physical,
# v7x: 64 MiB physical per TC -> 48 MiB scoped leaves 16 MiB headroom).
_TILE_BYTES_BUDGET = 8 << 20
_VMEM_LIMIT_BYTES = 48 << 20


def _lane_dense_2d(shape):
    """Pick a (rows, lanes) factorization of `shape` with a 128-dense last dim.

    Only contiguous trailing-axis groupings are considered, so the reshape is
    pure layout plumbing (no data movement).  Falls back to the first grouping
    >= 128 (masked tail stores) if no 128-multiple exists.
    """
    total = int(np.prod(shape))
    candidates = []
    tail = 1
    for d in reversed(shape):           # e.g. NCHW -> W, H*W, C*H*W, B*C*H*W
        tail *= int(d)
        candidates.append(tail)
    for lanes in candidates:
        if lanes % 128 == 0:
            return total // lanes, lanes
    for lanes in candidates:            # no 128-dense grouping exists
        if lanes >= 128:
            return total // lanes, lanes
    return 1, total                     # tiny array: single full-dim block


def _pick_tiles(rows, lanes, itemsize):
    """Dtype/shape-aware (tile_r, tile_c) within the VMEM byte budget."""
    # Packed dtypes need bigger sublane multiples: 8 (f32) / 16 (bf16) / 32 (i8).
    sub = max(8, 8 * (4 // max(1, itemsize)))

    # Lane (last-dim) tile: multiple of 128, or the full dim (the only legal
    # choice when lanes is not a multiple of 128).
    if lanes % 128 != 0:
        tile_c = lanes
    else:
        max_c = max(128, (_TILE_BYTES_BUDGET // (sub * itemsize)) // 128 * 128)
        tile_c = min(lanes, max_c)

    # Row (sublane) tile: dtype-aware multiple, sized to fill the byte budget.
    if rows <= sub:
        tile_r = rows                   # full dim — always legal
    else:
        budget_rows = max(sub, _TILE_BYTES_BUDGET // max(1, tile_c * itemsize))
        tile_r = min(rows, budget_rows)
        tile_r -= tile_r % sub
        tile_r = max(tile_r, sub)
    return tile_r, tile_c


def conditional_score_estimator_forward(x_t, y, t):
    """Pallas-backed forward scaffold for the abstract ConditionalScoreEstimator.

    Args:
      x_t: (B, C, H, W) noisy sample, NCHW.
      y:   conditioning tensor (unused by the abstract base class).
      t:   timestep tensor     (unused by the abstract base class).
    Returns:
      Tensor with the shape/dtype of x_t.
    """
    del y, t  # unused by the abstract base class

    orig_shape = x_t.shape
    rows, lanes = _lane_dense_2d(orig_shape)
    x2d = x_t.reshape(rows, lanes)

    itemsize = jnp.dtype(x2d.dtype).itemsize
    tile_r, tile_c = _pick_tiles(rows, lanes, itemsize)
    grid = (pl.cdiv(rows, tile_r), pl.cdiv(lanes, tile_c))

    out2d = pl.pallas_call(
        _score_interface_kernel,
        out_shape=jax.ShapeDtypeStruct((rows, lanes), x2d.dtype),
        grid=grid,
        in_specs=[pl.BlockSpec((tile_r, tile_c), lambda i, j: (i, j))],
        out_specs=pl.BlockSpec((tile_r, tile_c), lambda i, j: (i, j)),
        # No input_output_aliases: callers here do not donate x_t, and an
        # undonated alias would force XLA to insert a defensive copy (3x HBM
        # traffic instead of 2x).  Re-add it only for donating callers.
        compiler_params=pltpu.CompilerParams(
            # Both tile axes are embarrassingly parallel: shards across the two
            # TensorCores on v7x; neutral on single-TC v5e/v6e.
            dimension_semantics=("parallel", "parallel"),
            vmem_limit_bytes=_VMEM_LIMIT_BYTES,
        ),
    )(x2d)

    return out2d.reshape(orig_shape)


if __name__ == "__main__":
    key = jax.random.PRNGKey(0)
    k1, k2, k3 = jax.random.split(key, 3)

    B, C, H, W = 2, 4, 16, 16
    x_t = jax.random.normal(k1, (B, C, H, W), dtype=jnp.float32)
    y = jax.random.normal(k2, (B, 8), dtype=jnp.float32)   # conditioning
    t = jax.random.uniform(k3, (B,), dtype=jnp.float32)    # timestep

    out = jax.block_until_ready(conditional_score_estimator_forward(x_t, y, t))

    assert out.shape == x_t.shape and out.dtype == x_t.dtype
    # No aliasing/donation, so x_t is intact and directly comparable.
    assert np.allclose(np.asarray(jax.device_get(out)),
                       np.asarray(jax.device_get(x_t)))
    print("KERNEL_OK")
</pallas_src>

<mosaic_0001>
module attributes {stable_mosaic.version = 11 : i64} {
  func.func @_score_interface_kernel(%arg0: i32, %arg1: i32, %arg2: memref<8x256xf32, #tpu.memory_space<vmem>>, %arg3: memref<8x256xf32, #tpu.memory_space<vmem>>) attributes {dimension_semantics = [#tpu.dimension_semantics<parallel>, #tpu.dimension_semantics<parallel>], iteration_bounds = array<i64: 1, 1>, scalar_prefetch = 0 : i64, scratch_operands = 0 : i64, tpu.core_type = #tpu.core_type<tc>, window_params = [{transform_indices = @transform_0, window_bounds = array<i64: 8, 256>}, {transform_indices = @transform_1, window_bounds = array<i64: 8, 256>}]} {
    %c0 = arith.constant 0 : index
    %c0_0 = arith.constant 0 : index
    %0 = vector.load %arg2[%c0, %c0_0] : memref<8x256xf32, #tpu.memory_space<vmem>>, vector<8x256xf32>
    %c0_1 = arith.constant 0 : index
    %c0_2 = arith.constant 0 : index
    %1 = vector.load %arg3[%c0_1, %c0_2] : memref<8x256xf32, #tpu.memory_space<vmem>>, vector<8x256xf32>
    tpu.vector_store %arg3[%c0_1, %c0_2], %0 {strides = array<i32>} : memref<8x256xf32, #tpu.memory_space<vmem>>, vector<8x256xf32>,
    return
  }
  func.func @transform_0(%arg0: i32, %arg1: i32) -> (i32, i32) {
    %c0_i32 = arith.constant 0 : i32
    return %arg0, %arg1 : i32, i32
  }
  func.func @transform_1(%arg0: i32, %arg1: i32) -> (i32, i32) {
    %c0_i32 = arith.constant 0 : i32
    return %arg0, %arg1 : i32, i32
  }
}

</mosaic_0001>

<bundles_post_ra>
// kernel: tpu_custom_call.1
= control target key start
LH: loop header
LB: loop body
LE: loop exit
PB: predicated region body
PF: predicated region fallthrough
CT: control target
= control target key end

     0   :  { %6 = vsyncpa [#allocation3], 0  ;;  %s126_s0 = inlined_call_operand.hbm [shape: f32[8,256], index: 0, kind: input, shape index: {}]   ;;  %s127_s1 = inlined_call_operand.hbm [shape: f32[8,256], index: 1, kind: output, shape index: {}]  }
   0x1   :  { %7 = vsyncpa [#allocation4], 0  ;;  %s90_s6 = smov [#allocation2]   ;;  %s42_s10 = scalar_lea.hbm %s126_s0, 256 }
   0x2   :  { %s14_s7 = sshll.u32 %s90_s6, 4  ;;  %p43_p0 = scmp.ne.s32.totalorder %s126_s0, %s42_s10  ;;  %s15_s7 = int_to_ptr.vmem [resolvable:$true] %s14_s7 }
   0x3   :  { %p46_p1 = scmp.lt.u32.totalorder %s42_s10, %s126_s0 }
   0x5   :  { %p48_p2 = pnand %p46_p1, %p43_p0 }
   0x7   :  { %51 = shalt.err (!%p48_p2)
}
   0x8   :  { %s52_s15 = scalar_lea.vmem %s15_s7, 256  ;;  %p57_p4 = scmp.lt.s32.totalorder %s15_s7, %s15_s7 }
   0x9   :  { %p53_p3 = scmp.ne.s32.totalorder %s15_s7, %s52_s15  ;;  %p58_p5 = scmp.lt.s32.totalorder %s52_s15, %s52_s15 }
   0xb   :  { %p59_p6 = por %p58_p5, %p57_p4 }
   0xd   :  { %p60_p7 = pnand %p59_p6, %p53_p3 }
   0xf   :  { %63 = shalt.err (!%p60_p7)
}
  0x10   :  { %17 = dma.hbm_to_vmem [thread:$0]  %s126_s0, 256, %s15_s7, [#allocation3]  }
  0x11   :  { %86 = dma.done.wait [#allocation3], 256  }
  0x12   :  { %87 = vsyncadd [#allocation3], 4294967040  ;;  %s91_s18 = smov [#allocation5]   ;;  %v21_v0 = vld [vmem:[#allocation2] sm:$0xff]  ;;  %v22_v1 = vld [vmem:[#allocation2 + $0x8] sm:$0xff] }
  0x13   :  { %s31_s19 = sshll.u32 %s91_s18, 4  ;;  %23 = vst [vmem:[#allocation5] sm:$0xff] %v21_v0  ;;  %24 = vst [vmem:[#allocation5 + $0x8] sm:$0xff] %v22_v1  ;;  %s32_s19 = int_to_ptr.vmem [resolvable:$true] %s31_s19 }
  0x14   :  { %s64_s20 = scalar_lea.vmem %s32_s19, 256  ;;  %p69_p9 = scmp.lt.s32.totalorder %s32_s19, %s32_s19 }
  0x15   :  { %p65_p8 = scmp.ne.s32.totalorder %s32_s19, %s64_s20  ;;  %p70_p10 = scmp.lt.s32.totalorder %s64_s20, %s64_s20 }
  0x17   :  { %p71_p11 = por %p70_p10, %p69_p9 }
  0x19   :  { %p72_p12 = pnand %p71_p11, %p65_p8 }
  0x1b   :  { %75 = shalt.err (!%p72_p12)
}
  0x1c   :  { %s76_s0 = scalar_lea.hbm %s127_s1, 256 }
  0x1d   :  { %p77_p13 = scmp.ne.s32.totalorder %s127_s1, %s76_s0  ;;  %p80_p0 = scmp.lt.u32.totalorder %s76_s0, %s127_s1 }
  0x1f   :  { %p82_p1 = pnand %p80_p0, %p77_p13 }
  0x21   :  { %85 = shalt.err (!%p82_p1)
}
  0x22   :  { %34 = dma.vmem_to_hbm [thread:$0]  %s32_s19, 256, %s127_s1, [#allocation4]  }
  0x23   :  { %88 = dma.done.wait [#allocation4], 256  }
  0x24   :  { %89 = vsyncadd [#allocation4], 4294967040 }
  0x25   :  { %38 = vsyncpa [#allocation3], 1 }
  0x26   :  { %39 = vsyncpa [#allocation4], 1 }

</bundles_post_ra>
